<compile_context>
chip_gen: v7x
topology: tpu7x:2x2x1
jax: 0.10.0
libtpu: 0.0.40
codegen_flags: <defaults>
</compile_context>

<pallas_src>
import functools

import jax
import jax.numpy as jnp
from jax import lax
from jax.experimental import pallas as pl
from jax.experimental.pallas import tpu as pltpu


def _round_up(n, m):
    return ((n + m - 1) // m) * m


def _node_embedding_kernel(n_residues, seg_width, pack, x_ref, w_ref, b_ref, out_ref):
    """One tile.

    x_ref  : [TM, pack*seg_width]  -- `pack` original rows packed per sublane row
    w_ref  : [pack*seg_width, pack*n_s]  -- block-diagonal fused weights
    b_ref  : [1, pack*n_s]
    out_ref: [TM, pack*n_s]  (lane-dense when pack*n_s is a multiple of 128)
    """
    x = x_ref[...]                                           # [TM, pack*D] f32
    col = lax.broadcasted_iota(jnp.int32, x.shape, 1)        # [TM, pack*D]
    big = jnp.int32(x.shape[1])                              # sentinel > any lane

    onehot = jnp.zeros(x.shape, jnp.float32)
    res_mask = jnp.zeros(x.shape, jnp.bool_)
    # Per packed segment: argmax over its residue lanes (first-max tie-break).
    for r in range(pack):
        lo = r * seg_width
        seg_res = (col >= lo) & (col < lo + n_residues)      # residue lanes of seg r
        xr = jnp.where(seg_res, x, -jnp.inf)
        mx = jnp.max(xr, axis=1, keepdims=True)              # [TM, 1]
        hit = seg_res & (xr == mx)
        idx = jnp.min(jnp.where(hit, col, big), axis=1, keepdims=True)
        onehot = onehot + (col == idx).astype(jnp.float32)
        res_mask = res_mask | seg_res

    # lhs = [ onehot | x_feats | x_sigma ] per segment, built in-place (pure VPU).
    lhs = jnp.where(res_mask, onehot, x)

    # One fused MXU matmul: embedding lookup + both linears for `pack` rows at once.
    out = jnp.dot(lhs, w_ref[...], preferred_element_type=jnp.float32) + b_ref[...]
    out_ref[...] = out.astype(out_ref.dtype)


def node_embedding(x, params, *, n_residues, residue_feats, sigma_embed_dim,
                   tile_m=None, out_dtype=jnp.float32):
    """x: [N, n_residues + residue_feats + sigma_embed_dim] float32."""
    N, D = x.shape
    assert D == n_residues + residue_feats + sigma_embed_dim

    emb_table = params["emb_table"]                 # [n_residues, n_s]
    w_feats = params["w_feats"]                     # [residue_feats, n_s]  (W.T)
    b_feats = params["b_feats"]                     # [n_s]
    w_sigma = params["w_sigma"]                     # [sigma_embed_dim, n_s]
    b_sigma = params["b_sigma"]                     # [n_s]
    n_s = emb_table.shape[1]

    # Fuse the three weight matrices into one [D, n_s] operand and one bias.
    w_full = jnp.concatenate([emb_table, w_feats, w_sigma], axis=0)   # [D, n_s]
    b_full = (b_feats + b_sigma).reshape(1, n_s)                      # [1, n_s]

    # Lane-dense packing factor: `pack` rows per stored 128-lane row.
    pack = 128 // n_s if 128 % n_s == 0 else 1
    row_align = 8 * pack

    # Tile selection: big tiles to amortize ~0.35us/step overhead; single step
    # for small N; >= 2 steps for larger N so v7x's two TCs both get work.
    if tile_m is None:
        if N <= 1024:
            tile_m = _round_up(N, row_align)
        else:
            tile_m = min(8192, _round_up(pl.cdiv(N, 2), row_align))
    tile_m = max(row_align, _round_up(min(tile_m, _round_up(N, row_align)), row_align))

    N_pad = _round_up(N, tile_m)
    if N_pad != N:
        x = jnp.pad(x, ((0, N_pad - N), (0, 0)))    # zero rows -> sliced off

    # Free, contiguous reshape: pack `pack` consecutive rows per packed row.
    M = N_pad // pack
    tm = tile_m // pack
    x_packed = x.reshape(M, pack * D)

    # Block-diagonal fused weights so one matmul emits all `pack` rows side by side.
    if pack > 1:
        zero = jnp.zeros((D, n_s), w_full.dtype)
        w_block = jnp.concatenate(
            [jnp.concatenate([w_full if c == r else zero for c in range(pack)], axis=1)
             for r in range(pack)], axis=0)                           # [pack*D, pack*n_s]
        b_block = jnp.tile(b_full, (1, pack))                         # [1, pack*n_s]
    else:
        w_block, b_block = w_full, b_full

    grid = (M // tm,)
    kernel = functools.partial(_node_embedding_kernel, n_residues, D, pack)

    # Raise the scoped-VMEM limit only if the double-buffered working set needs it
    # (v5e default is 16 MiB; v6e/v7x default 32 MiB).
    out_itemsize = jnp.dtype(out_dtype).itemsize
    est_vmem = (2 * tm * _round_up(pack * D, 128) * 4
                + 2 * tm * _round_up(pack * n_s, 128) * out_itemsize
                + _round_up(pack * D, 8) * _round_up(pack * n_s, 128) * 4)
    vmem_limit = int(min(est_vmem + (8 << 20), 48 << 20)) if est_vmem > (12 << 20) else None

    out = pl.pallas_call(
        kernel,
        out_shape=jax.ShapeDtypeStruct((M, pack * n_s), out_dtype),
        grid_spec=pltpu.PrefetchScalarGridSpec(
            num_scalar_prefetch=0,
            grid=grid,
            in_specs=[
                pl.BlockSpec((tm, pack * D), lambda i: (i, 0)),       # packed x rows
                pl.BlockSpec((pack * D, pack * n_s), lambda i: (0, 0)),  # fused weights
                pl.BlockSpec((1, pack * n_s), lambda i: (0, 0)),      # fused bias
            ],
            out_specs=pl.BlockSpec((tm, pack * n_s), lambda i: (i, 0)),
        ),
        compiler_params=pltpu.CompilerParams(
            dimension_semantics=("parallel",),
            vmem_limit_bytes=vmem_limit),
    )(x_packed, w_block, b_block)

    out = out.reshape(N_pad, n_s)           # free: undoes the row packing
    return out[:N] if N_pad != N else out


def _reference(x, params, *, n_residues, residue_feats, sigma_embed_dim):
    idx = jnp.argmax(x[:, :n_residues], axis=1)
    type_emb = params["emb_table"][idx]
    xf = x[:, n_residues:n_residues + residue_feats]
    xs = x[:, n_residues + residue_feats:]
    feats_emb = xf @ params["w_feats"] + params["b_feats"]
    sigma_emb = xs @ params["w_sigma"] + params["b_sigma"]
    return feats_emb + type_emb + sigma_emb


if __name__ == "__main__":
    n_residues, residue_feats, sigma_embed_dim, n_s = 20, 12, 8, 32

    key = jax.random.PRNGKey(0)
    k_x, k_emb, k_wf, k_bf, k_ws, k_bs, k_x2, k_x3 = jax.random.split(key, 8)

    params = {
        # nn.Embedding(n_residues, n_s).weight
        "emb_table": jax.random.normal(k_emb, (n_residues, n_s), jnp.float32) * 0.1,
        # nn.Linear(residue_feats, n_s): transposed weight so x @ W.T == x @ w
        "w_feats": jax.random.normal(k_wf, (residue_feats, n_s), jnp.float32) * 0.1,
        "b_feats": jax.random.normal(k_bf, (n_s,), jnp.float32) * 0.1,
        # nn.Linear(sigma_embed_dim, n_s)
        "w_sigma": jax.random.normal(k_ws, (sigma_embed_dim, n_s), jnp.float32) * 0.1,
        "b_sigma": jax.random.normal(k_bs, (n_s,), jnp.float32) * 0.1,
    }

    D = n_residues + residue_feats + sigma_embed_dim
    kw = dict(n_residues=n_residues, residue_feats=residue_feats,
              sigma_embed_dim=sigma_embed_dim)

    # check 1: small N, single tile, exercises padding inside one step
    N = 16
    x = jax.random.normal(k_x, (N, D), jnp.float32)
    out = jax.block_until_ready(node_embedding(x, params, **kw))
    ref = _reference(x, params, **kw)
    assert out.shape == (N, n_s)
    assert jnp.allclose(out, ref, atol=1e-4, rtol=1e-4), "mismatch vs reference"

    # check 2: ragged N with explicit small tile -> multi-step parallel grid + padding
    N2 = 203
    x2 = jax.random.normal(k_x2, (N2, D), jnp.float32)
    out2 = jax.block_until_ready(node_embedding(x2, params, tile_m=64, **kw))
    ref2 = _reference(x2, params, **kw)
    assert out2.shape == (N2, n_s)
    assert jnp.allclose(out2, ref2, atol=1e-4, rtol=1e-4), "mismatch (padded)"

    # check 3: moderate N exercising the auto-tiling (>= 2 grid steps) path
    N3 = 1280
    x3 = jax.random.normal(k_x3, (N3, D), jnp.float32)
    out3 = jax.block_until_ready(node_embedding(x3, params, **kw))
    ref3 = _reference(x3, params, **kw)
    assert out3.shape == (N3, n_s)
    assert jnp.allclose(out3, ref3, atol=1e-4, rtol=1e-4), "mismatch (auto tile)"

    print("KERNEL_OK")
</pallas_src>

<mosaic_0001>
module attributes {stable_mosaic.version = 11 : i64} {
  func.func @_node_embedding_kernel(%arg0: i32, %arg1: memref<8x160xf32, #tpu.memory_space<vmem>>, %arg2: memref<160x128xf32, #tpu.memory_space<vmem>>, %arg3: memref<1x128xf32, #tpu.memory_space<vmem>>, %arg4: memref<8x128xf32, #tpu.memory_space<vmem>>) attributes {dimension_semantics = [#tpu.dimension_semantics<parallel>], iteration_bounds = array<i64: 1>, scalar_prefetch = 0 : i64, scratch_operands = 0 : i64, tpu.core_type = #tpu.core_type<tc>, window_params = [{transform_indices = @transform_0, window_bounds = array<i64: 8, 160>}, {pipeline_mode = #tpu.pipeline_mode<synchronous>, transform_indices = @transform_1, window_bounds = array<i64: 160, 128>}, {pipeline_mode = #tpu.pipeline_mode<synchronous>, transform_indices = @transform_2, window_bounds = array<i64: 1, 128>}, {transform_indices = @transform_3, window_bounds = array<i64: 8, 128>}]} {
    %c0 = arith.constant 0 : index
    %c0_0 = arith.constant 0 : index
    %0 = vector.load %arg1[%c0, %c0_0] : memref<8x160xf32, #tpu.memory_space<vmem>>, vector<8x160xf32>
    %1 = tpu.iota {dimensions = array<i32: 1>} : vector<8x160xi32>
    %cst = arith.constant 0.000000e+00 : f32
    %2 = vector.broadcast %cst : f32 to vector<8x160xf32>
    %false = arith.constant false
    %3 = vector.broadcast %false : i1 to vector<8x160xi1>
    %c0_i32 = arith.constant 0 : i32
    %4 = vector.broadcast %c0_i32 : i32 to vector<8x160xi32>
    %5 = arith.cmpi sge, %1, %4 : vector<8x160xi32>
    %c20_i32 = arith.constant 20 : i32
    %6 = vector.broadcast %c20_i32 : i32 to vector<8x160xi32>
    %7 = arith.cmpi slt, %1, %6 : vector<8x160xi32>
    %8 = arith.andi %5, %7 : vector<8x160xi1>
    %cst_1 = arith.constant 0xFF800000 : f32
    %9 = vector.broadcast %cst_1 : f32 to vector<8x160xf32>
    %10 = arith.select %8, %0, %9 : vector<8x160xi1>, vector<8x160xf32>
    %cst_2 = arith.constant dense<0xFF800000> : vector<8xf32>
    %11 = vector.multi_reduction <maximumf>, %10, %cst_2 [1] : vector<8x160xf32> to vector<8xf32>
    %12 = vector.shape_cast %11 : vector<8xf32> to vector<8x1xf32>
    %13 = vector.broadcast %12 : vector<8x1xf32> to vector<8x160xf32>
    %14 = arith.cmpf oeq, %10, %13 : vector<8x160xf32>
    %15 = arith.andi %8, %14 : vector<8x160xi1>
    %c160_i32 = arith.constant 160 : i32
    %16 = vector.broadcast %c160_i32 : i32 to vector<8x160xi32>
    %17 = arith.select %15, %1, %16 : vector<8x160xi1>, vector<8x160xi32>
    %cst_3 = arith.constant dense<2147483647> : vector<8xi32>
    %18 = vector.multi_reduction <minsi>, %17, %cst_3 [1] : vector<8x160xi32> to vector<8xi32>
    %19 = vector.shape_cast %18 : vector<8xi32> to vector<8x1xi32>
    %20 = vector.broadcast %19 : vector<8x1xi32> to vector<8x160xi32>
    %21 = arith.cmpi eq, %1, %20 : vector<8x160xi32>
    %22 = arith.extui %21 : vector<8x160xi1> to vector<8x160xi32>
    %23 = arith.sitofp %22 : vector<8x160xi32> to vector<8x160xf32>
    %24 = arith.addf %2, %23 : vector<8x160xf32>
    %25 = arith.ori %3, %8 : vector<8x160xi1>
    %c40_i32 = arith.constant 40 : i32
    %26 = vector.broadcast %c40_i32 : i32 to vector<8x160xi32>
    %27 = arith.cmpi sge, %1, %26 : vector<8x160xi32>
    %c60_i32 = arith.constant 60 : i32
    %28 = vector.broadcast %c60_i32 : i32 to vector<8x160xi32>
    %29 = arith.cmpi slt, %1, %28 : vector<8x160xi32>
    %30 = arith.andi %27, %29 : vector<8x160xi1>
    %cst_4 = arith.constant 0xFF800000 : f32
    %31 = vector.broadcast %cst_4 : f32 to vector<8x160xf32>
    %32 = arith.select %30, %0, %31 : vector<8x160xi1>, vector<8x160xf32>
    %cst_5 = arith.constant dense<0xFF800000> : vector<8xf32>
    %33 = vector.multi_reduction <maximumf>, %32, %cst_5 [1] : vector<8x160xf32> to vector<8xf32>
    %34 = vector.shape_cast %33 : vector<8xf32> to vector<8x1xf32>
    %35 = vector.broadcast %34 : vector<8x1xf32> to vector<8x160xf32>
    %36 = arith.cmpf oeq, %32, %35 : vector<8x160xf32>
    %37 = arith.andi %30, %36 : vector<8x160xi1>
    %c160_i32_6 = arith.constant 160 : i32
    %38 = vector.broadcast %c160_i32_6 : i32 to vector<8x160xi32>
    %39 = arith.select %37, %1, %38 : vector<8x160xi1>, vector<8x160xi32>
    %cst_7 = arith.constant dense<2147483647> : vector<8xi32>
    %40 = vector.multi_reduction <minsi>, %39, %cst_7 [1] : vector<8x160xi32> to vector<8xi32>
    %41 = vector.shape_cast %40 : vector<8xi32> to vector<8x1xi32>
    %42 = vector.broadcast %41 : vector<8x1xi32> to vector<8x160xi32>
    %43 = arith.cmpi eq, %1, %42 : vector<8x160xi32>
    %44 = arith.extui %43 : vector<8x160xi1> to vector<8x160xi32>
    %45 = arith.sitofp %44 : vector<8x160xi32> to vector<8x160xf32>
    %46 = arith.addf %24, %45 : vector<8x160xf32>
    %47 = arith.ori %25, %30 : vector<8x160xi1>
    %c80_i32 = arith.constant 80 : i32
    %48 = vector.broadcast %c80_i32 : i32 to vector<8x160xi32>
    %49 = arith.cmpi sge, %1, %48 : vector<8x160xi32>
    %c100_i32 = arith.constant 100 : i32
    %50 = vector.broadcast %c100_i32 : i32 to vector<8x160xi32>
    %51 = arith.cmpi slt, %1, %50 : vector<8x160xi32>
    %52 = arith.andi %49, %51 : vector<8x160xi1>
    %cst_8 = arith.constant 0xFF800000 : f32
    %53 = vector.broadcast %cst_8 : f32 to vector<8x160xf32>
    %54 = arith.select %52, %0, %53 : vector<8x160xi1>, vector<8x160xf32>
    %cst_9 = arith.constant dense<0xFF800000> : vector<8xf32>
    %55 = vector.multi_reduction <maximumf>, %54, %cst_9 [1] : vector<8x160xf32> to vector<8xf32>
    %56 = vector.shape_cast %55 : vector<8xf32> to vector<8x1xf32>
    %57 = vector.broadcast %56 : vector<8x1xf32> to vector<8x160xf32>
    %58 = arith.cmpf oeq, %54, %57 : vector<8x160xf32>
    %59 = arith.andi %52, %58 : vector<8x160xi1>
    %c160_i32_10 = arith.constant 160 : i32
    %60 = vector.broadcast %c160_i32_10 : i32 to vector<8x160xi32>
    %61 = arith.select %59, %1, %60 : vector<8x160xi1>, vector<8x160xi32>
    %cst_11 = arith.constant dense<2147483647> : vector<8xi32>
    %62 = vector.multi_reduction <minsi>, %61, %cst_11 [1] : vector<8x160xi32> to vector<8xi32>
    %63 = vector.shape_cast %62 : vector<8xi32> to vector<8x1xi32>
    %64 = vector.broadcast %63 : vector<8x1xi32> to vector<8x160xi32>
    %65 = arith.cmpi eq, %1, %64 : vector<8x160xi32>
    %66 = arith.extui %65 : vector<8x160xi1> to vector<8x160xi32>
    %67 = arith.sitofp %66 : vector<8x160xi32> to vector<8x160xf32>
    %68 = arith.addf %46, %67 : vector<8x160xf32>
    %69 = arith.ori %47, %52 : vector<8x160xi1>
    %c120_i32 = arith.constant 120 : i32
    %70 = vector.broadcast %c120_i32 : i32 to vector<8x160xi32>
    %71 = arith.cmpi sge, %1, %70 : vector<8x160xi32>
    %c140_i32 = arith.constant 140 : i32
    %72 = vector.broadcast %c140_i32 : i32 to vector<8x160xi32>
    %73 = arith.cmpi slt, %1, %72 : vector<8x160xi32>
    %74 = arith.andi %71, %73 : vector<8x160xi1>
    %cst_12 = arith.constant 0xFF800000 : f32
    %75 = vector.broadcast %cst_12 : f32 to vector<8x160xf32>
    %76 = arith.select %74, %0, %75 : vector<8x160xi1>, vector<8x160xf32>
    %cst_13 = arith.constant dense<0xFF800000> : vector<8xf32>
    %77 = vector.multi_reduction <maximumf>, %76, %cst_13 [1] : vector<8x160xf32> to vector<8xf32>
    %78 = vector.shape_cast %77 : vector<8xf32> to vector<8x1xf32>
    %79 = vector.broadcast %78 : vector<8x1xf32> to vector<8x160xf32>
    %80 = arith.cmpf oeq, %76, %79 : vector<8x160xf32>
    %81 = arith.andi %74, %80 : vector<8x160xi1>
    %c160_i32_14 = arith.constant 160 : i32
    %82 = vector.broadcast %c160_i32_14 : i32 to vector<8x160xi32>
    %83 = arith.select %81, %1, %82 : vector<8x160xi1>, vector<8x160xi32>
    %cst_15 = arith.constant dense<2147483647> : vector<8xi32>
    %84 = vector.multi_reduction <minsi>, %83, %cst_15 [1] : vector<8x160xi32> to vector<8xi32>
    %85 = vector.shape_cast %84 : vector<8xi32> to vector<8x1xi32>
    %86 = vector.broadcast %85 : vector<8x1xi32> to vector<8x160xi32>
    %87 = arith.cmpi eq, %1, %86 : vector<8x160xi32>
    %88 = arith.extui %87 : vector<8x160xi1> to vector<8x160xi32>
    %89 = arith.sitofp %88 : vector<8x160xi32> to vector<8x160xf32>
    %90 = arith.addf %68, %89 : vector<8x160xf32>
    %91 = arith.ori %69, %74 : vector<8x160xi1>
    %92 = arith.select %91, %90, %0 : vector<8x160xi1>, vector<8x160xf32>
    %c0_16 = arith.constant 0 : index
    %c0_17 = arith.constant 0 : index
    %93 = vector.load %arg2[%c0_16, %c0_17] : memref<160x128xf32, #tpu.memory_space<vmem>>, vector<160x128xf32>
    %cst_18 = arith.constant dense<0.000000e+00> : vector<8x128xf32>
    %94 = tpu.matmul %92, %93, %cst_18 {dimension_numbers = #tpu.dot_dimension_numbers<[1], [0], [0], [1], [0, 0, 1, 1], [], []>} : vector<8x160xf32>, vector<160x128xf32>, vector<8x128xf32> -> vector<8x128xf32>
    %c0_19 = arith.constant 0 : index
    %c0_20 = arith.constant 0 : index
    %95 = vector.load %arg3[%c0_19, %c0_20] : memref<1x128xf32, #tpu.memory_space<vmem>>, vector<1x128xf32>
    %96 = vector.broadcast %95 : vector<1x128xf32> to vector<8x128xf32>
    %97 = arith.addf %94, %96 : vector<8x128xf32>
    %c0_21 = arith.constant 0 : index
    %c0_22 = arith.constant 0 : index
    %98 = vector.load %arg4[%c0_21, %c0_22] : memref<8x128xf32, #tpu.memory_space<vmem>>, vector<8x128xf32>
    tpu.vector_store %arg4[%c0_21, %c0_22], %97 {strides = array<i32>} : memref<8x128xf32, #tpu.memory_space<vmem>>, vector<8x128xf32>,
    return
  }
  func.func @transform_0(%arg0: i32) -> (i32, i32) {
    %c0_i32 = arith.constant 0 : i32
    %c0_i32_0 = arith.constant 0 : i32
    return %arg0, %c0_i32 : i32, i32
  }
  func.func @transform_1(%arg0: i32) -> (i32, i32) {
    %c0_i32 = arith.constant 0 : i32
    %c0_i32_0 = arith.constant 0 : i32
    %c0_i32_1 = arith.constant 0 : i32
    return %c0_i32, %c0_i32_0 : i32, i32
  }
  func.func @transform_2(%arg0: i32) -> (i32, i32) {
    %c0_i32 = arith.constant 0 : i32
    %c0_i32_0 = arith.constant 0 : i32
    %c0_i32_1 = arith.constant 0 : i32
    return %c0_i32, %c0_i32_0 : i32, i32
  }
  func.func @transform_3(%arg0: i32) -> (i32, i32) {
    %c0_i32 = arith.constant 0 : i32
    %c0_i32_0 = arith.constant 0 : i32
    return %arg0, %c0_i32 : i32, i32
  }
}

</mosaic_0001>

<bundles_post_ra>
// kernel: tpu_custom_call.1
= control target key start
LH: loop header
LB: loop body
LE: loop exit
PB: predicated region body
PF: predicated region fallthrough
CT: control target
= control target key end

     0   :  { %8 = vsyncpa [#allocation3], 0  ;;  %s639_s0 = inlined_call_operand.hbm [shape: f32[8,160], index: 0, kind: input, shape index: {}]   ;;  %s640_s1 = inlined_call_operand.hbm [shape: f32[160,128], index: 1, kind: input, shape index: {}]   ;;  %s641_s2 = inlined_call_operand.vmem [shape: f32[1,128], index: 2, kind: input, shape index: {}]   ;;  %s642_s3 = inlined_call_operand.hbm [shape: f32[8,128], index: 3, kind: output, shape index: {}]  }
   0x1   :  { %9 = vsyncpa [#allocation6], 0 }
   0x2   :  { %10 = vsyncpa [#allocation4], 0  ;;  %s467_s12 = smov [#allocation2]   ;;  %s468_s14 = smov [#allocation5]  }
   0x3   :  { %s17_s13 = sshll.u32 %s467_s12, 4  ;;  %s26_s15 = sshll.u32 %s468_s14, 4  ;;  %s18_s13 = int_to_ptr.vmem [resolvable:$true] %s17_s13  ;;  %s495_s15 = int_to_ptr.vmem [resolvable:$true] %s26_s15 }
   0x4   :  { %s395_s18 = scalar_lea.hbm %s639_s0, 256 }
   0x5   :  { %p396_p0 = scmp.ne.s32.totalorder %s639_s0, %s395_s18  ;;  %p399_p1 = scmp.lt.u32.totalorder %s395_s18, %s639_s0 }
   0x7   :  { %p401_p2 = pnand %p399_p1, %p396_p0 }
   0x9   :  { %404 = shalt.err (!%p401_p2)
}
   0xa   :  { %s405_s23 = scalar_lea.vmem %s18_s13, 256  ;;  %p410_p4 = scmp.lt.s32.totalorder %s18_s13, %s18_s13 }
   0xb   :  { %p406_p3 = scmp.ne.s32.totalorder %s18_s13, %s405_s23  ;;  %p411_p5 = scmp.lt.s32.totalorder %s405_s23, %s405_s23 }
   0xd   :  { %p412_p6 = por %p411_p5, %p410_p4 }
   0xf   :  { %p413_p7 = pnand %p412_p6, %p406_p3 }
  0x11   :  { %416 = shalt.err (!%p413_p7)
}
  0x12   :  { %20 = dma.hbm_to_vmem [thread:$0]  %s639_s0, 256, %s18_s13, [#allocation3]  }
  0x13   :  { %s417_s28 = scalar_lea.hbm %s640_s1, 2560 }
  0x14   :  { %p418_p8 = scmp.ne.s32.totalorder %s640_s1, %s417_s28  ;;  %p421_p9 = scmp.lt.u32.totalorder %s417_s28, %s640_s1 }
  0x16   :  { %p423_p10 = pnand %p421_p9, %p418_p8 }
  0x18   :  { %426 = shalt.err (!%p423_p10)
}
  0x19   :  { %s427_s6 = scalar_lea.vmem %s495_s15, 2560  ;;  %p432_p12 = scmp.lt.s32.totalorder %s495_s15, %s495_s15 }
  0x1a   :  { %p428_p11 = scmp.ne.s32.totalorder %s495_s15, %s427_s6  ;;  %p433_p13 = scmp.lt.s32.totalorder %s427_s6, %s427_s6 }
  0x1c   :  { %p434_p0 = por %p433_p13, %p432_p12 }
  0x1e   :  { %p435_p1 = pnand %p434_p0, %p428_p11 }
  0x20   :  { %438 = shalt.err (!%p435_p1)
}
  0x21   :  { %s469_s0 = smov 128   ;;  %s470_s7 = smov 8  }
  0x22   :  { %32 = dma.hbm_to_vmem [thread:$0]  %s640_s1, 2560, %s495_s15, [#allocation6], %s469_s0, %s469_s0, %s470_s7  }
  0x23   :  { %461 = dma.done.wait [#allocation3], 256  }
  0x24   :  { %462 = vsyncadd [#allocation3], 4294967040 }
  0x25   :  { %463 = dma.done.wait [#allocation6], 2560  }
  0x26   :  { %464 = vsyncadd [#allocation6], 4294964736  ;;  %v43_v0 = vlaneseq  ;;  %v541_v4 = vld [vmem:[#allocation2] sm:$0xff]  ;;  %v547_v6 = vld [vmem:[#allocation2 + $0x8] sm:$0xff]  ;;  %vm54_vm8 = vcmask 261120   ;;  %v472_v41 = vmov 0.0|0.0  }
  0x27   :  { %v471_v16 = vmov 2147483647   ;;  %v227_v38 = vld [vmem:[#allocation5] sm:$0xff]  ;;  %v228_v39 = vld [vmem:[#allocation5 + $0x8] sm:$0xff]  ;;  %v229_v40 = vld [vmem:[#allocation5 + $0x10] sm:$0xff]  ;;  %357 = vmatprep.subr.bf16.mxu0 %v472_v41  ;;  %s474_s11 = smov [#allocation7]  }
  0x28   :  { %v526_v1 = vand.u32 127, %v43_v0  ;;  %v65_v17 = vsel %vm54_vm8, 160, %v471_v16  ;;  %v358_v42 = vpack.c.bf16 %v228_v39, %v227_v38  ;;  %v230_v43 = vld [vmem:[#allocation5 + $0x18] sm:$0xff]  ;;  %v231_v45 = vld [vmem:[#allocation5 + $0x20] sm:$0xff]  ;;  %v232_v46 = vld [vmem:[#allocation5 + $0x28] sm:$0xff]  ;;  %s334_s12 = sshll.u32 %s474_s11, 4  ;;  %s335_s12 = int_to_ptr.vmem [resolvable:$true] %s334_s12 }
  0x29   :  { %v361_v44 = vpack.c.bf16 %v230_v43, %v229_v40  ;;  %v364_v47 = vpack.c.bf16 %v232_v46, %v231_v45  ;;  %v233_v48 = vld [vmem:[#allocation5 + $0x30] sm:$0xff]  ;;  %v234_v49 = vld [vmem:[#allocation5 + $0x38] sm:$0xff]  ;;  %v235_v51 = vld [vmem:[#allocation5 + $0x40] sm:$0xff]  ;;  %v473_v43 = vmov 0.0   ;;  %s439_s13 = scalar_lea.vmem %s335_s12, 128  ;;  %p444_p3 = scmp.lt.s32.totalorder %s335_s12, %s335_s12 }
  0x2a   :  { %vm135_vm0 = vcmp.ge.s32.totalorder %v526_v1, 80  ;;  %vm137_vm1 = vcmp.lt.s32.totalorder %v526_v1, 100  ;;  %vm90_vm2 = vcmp.ge.s32.totalorder %v526_v1, 40  ;;  %vm48_vm3 = vcmp.lt.s32.totalorder %v526_v1, 20  ;;  %359 = vmatpush1.bf16.msra.mxu0 %v358_v42  ;;  %v236_v52 = vld [vmem:[#allocation5 + $0x48] sm:$0xff]  ;;  %v237_v54 = vld [vmem:[#allocation5 + $0x50] sm:$0xff]  ;;  %p440_p2 = scmp.ne.s32.totalorder %s335_s12, %s439_s13  ;;  %p445_p4 = scmp.lt.s32.totalorder %s439_s13, %s439_s13 }
  0x2b   :  { %vm532_vm4 = vmand %vm135_vm0, %vm137_vm1  ;;  %vm92_vm5 = vcmp.lt.s32.totalorder %v526_v1, 60  ;;  %v538_v3 = vadd.s32 128, %v526_v1  ;;  %vm180_vm6 = vcmp.ge.s32.totalorder %v526_v1, 120  ;;  %v52_v7 = vsel %vm48_vm3, %v541_v4, -inf  ;;  %360 = vmatprep.subr.bf16.mxu0 %v472_v41  ;;  %v238_v55 = vld [vmem:[#allocation5 + $0x58] sm:$0xff]  ;;  %v240_v16 = vld [vmem:[#allocation5 + $0x68] sm:$0xff] }
  0x2c   :  { %vm543_vm7 = vmand %vm90_vm2, %vm92_vm5  ;;  %v141_v8 = vsel %vm532_vm4, %v541_v4, -inf  ;;  %v186_v9 = vsel %vm180_vm6, %v541_v4, -inf  ;;  %57 = vmax.xlane.f32.xlu0 %v52_v7  ;;  %v367_v50 = vpack.c.bf16 %v234_v49, %v233_v48  ;;  %v370_v53 = vpack.c.bf16 %v236_v52, %v235_v51  ;;  %p446_p5 = por %p445_p4, %p444_p3 }
  0x2d   :  { %vm183_vm9 = vcmp.lt.s32.totalorder %v538_v3, 140  ;;  %145 = vmax.xlane.f32.xlu1 %v141_v8  ;;  %v96_v11 = vsel %vm543_vm7, %v541_v4, -inf  ;;  %v373_v56 = vpack.c.bf16 %v238_v55, %v237_v54 }
  0x2e   :  { %v187_v10 = vsel %vm183_vm9, %v547_v6, -inf  ;;  %362 = vmatpush1.bf16.msra.mxu0 %v361_v44  ;;  %p447_p6 = pnand %p446_p5, %p440_p2 }
  0x2f   :  { %v188_v12 = vsel %vm54_vm8, %v187_v10, -inf  ;;  %363 = vmatprep.subr.bf16.mxu0 %v472_v41 }
  0x30   :  { %v189_v13 = vmax.f32 %v186_v9, %v188_v12  ;;  %100 = vmax.xlane.f32.xlu0 %v96_v11 }
  0x32   :  { %190 = vmax.xlane.f32.xlu1 %v189_v13  ;;  %365 = vmatpush1.bf16.msra.mxu0 %v364_v47 }
  0x33   :  { %366 = vmatprep.subr.bf16.mxu0 %v472_v41 }
  0x36   :  { %368 = vmatpush1.bf16.msra.mxu0 %v367_v50 }
  0x37   :  { %369 = vmatprep.subr.bf16.mxu0 %v472_v41 }
  0x3a   :  { %371 = vmatpush1.bf16.msra.mxu0 %v370_v53 }
  0x3b   :  { %372 = vmatprep.subr.bf16.mxu0 %v472_v41 }
  0x3e   :  { %374 = vmatpush1.bf16.msra.mxu0 %v373_v56 }
  0x3f   :  { %375 = vmatprep.subr.bf16.mxu0 %v472_v41 }
  0xb9   :  { %v58_v14 = vpop.xlane.xlu0 %57 }
  0xba   :  { %v146_v15 = vpop.xlane.xlu1 %145  ;;  %vm59_vm10 = vcmp.eq.f32.partialorder %v52_v7, %v58_v14 }
  0xbb   :  { %vm147_vm11 = vcmp.eq.f32.partialorder %v141_v8, %v146_v15  ;;  %vm61_vm12 = vmand %vm48_vm3, %vm59_vm10  ;;  %v239_v15 = vld [vmem:[#allocation5 + $0x60] sm:$0xff] }
  0xbc   :  { %v63_v18 = vsel %vm61_vm12, %v526_v1, 160  ;;  %vm149_vm13 = vmand %vm532_vm4, %vm147_vm11 }
  0xbd   :  { %vm66_vm14 = vcmp.lt.s32.totalorder %v63_v18, %v65_v17  ;;  %v151_v19 = vsel %vm149_vm13, %v526_v1, 160  ;;  %v101_v20 = vpop.xlane.xlu0 %100 }
  0xbe   :  { %vm154_vm15 = vcmp.lt.s32.totalorder %v151_v19, %v65_v17  ;;  %vm102_vm0 = vcmp.eq.f32.partialorder %v96_v11, %v101_v20  ;;  %v67_v22 = vsel %vm66_vm14, %v63_v18, %v65_v17  ;;  %v241_v18 = vld [vmem:[#allocation5 + $0x70] sm:$0xff] }
  0xbf   :  { %v191_v21 = vpop.xlane.xlu1 %190  ;;  %vm104_vm5 = vmand %vm543_vm7, %vm102_vm0  ;;  %v575_v23 = vsel %vm154_vm15, %v151_v19, %v65_v17  ;;  %v69_v25 = vshra.s32 %v67_v22, 16  ;;  %v68_v57 = vand.u32 65535, %v67_v22  ;;  %v242_v19 = vld [vmem:[#allocation5 + $0x78] sm:$0xff]  ;;  %v244_v22 = vld [vmem:[#allocation5 + $0x88] sm:$0xff] }
  0xc0   :  { %vm192_vm1 = vcmp.eq.f32.partialorder %v186_v9, %v191_v21  ;;  %vm193_vm2 = vcmp.eq.f32.partialorder %v187_v10, %v191_v21  ;;  %v106_v24 = vsel %vm104_vm5, %v526_v1, 160  ;;  %v157_v29 = vshra.s32 %v575_v23, 16  ;;  %v243_v21 = vld [vmem:[#allocation5 + $0x80] sm:$0xff] }
  0xc1   :  { %vm194_vm10 = vmand %vm180_vm6, %vm192_vm1  ;;  %vm109_vm11 = vcmp.lt.s32.totalorder %v106_v24, %v65_v17  ;;  %v71_v28 = vcvt.s32.f32 %v69_v25  ;;  %v70_v60 = vcvt.s32.f32 %v68_v57  ;;  %v156_v61 = vand.u32 65535, %v575_v23  ;;  %v246_v25 = vld [vmem:[#allocation5 + $0x98] sm:$0xff] }
  0xc2   :  { %vm195_vm12 = vmand %vm183_vm9, %vm193_vm2  ;;  %v196_v26 = vsel %vm194_vm10, %v526_v1, 160  ;;  %v110_v30 = vsel %vm109_vm11, %v106_v24, %v65_v17  ;;  %v159_v35 = vcvt.s32.f32 %v157_v29  ;;  %v376_v17 = vpack.c.bf16 %v240_v16, %v239_v15  ;;  %v245_v24 = vld [vmem:[#allocation5 + $0x90] sm:$0xff] }
  0xc3   :  { %v197_v27 = vsel %vm195_vm12, %v538_v3, 160  ;;  %v112_v32 = vshra.s32 %v110_v30, 16  ;;  %72 = vmin.xlane.f32.xlu0 %v71_v28  ;;  %v111_v58 = vand.u32 65535, %v110_v30  ;;  %v158_v9 = vcvt.s32.f32 %v156_v61  ;;  %vm603_vm10 = vmor %vm48_vm3, %vm543_vm7 }
  0xc4   :  { %v198_v31 = vsel %vm54_vm8, %v197_v27, 2147483647  ;;  %377 = vmatpush1.bf16.msra.mxu0 %v376_v17  ;;  %v379_v20 = vpack.c.bf16 %v242_v19, %v241_v18  ;;  %v382_v23 = vpack.c.bf16 %v244_v22, %v243_v21  ;;  %vm178_vm3 = vmor %vm603_vm10, %vm532_vm4 }
  0xc5   :  { %vm199_vm13 = vcmp.lt.s32.totalorder %v196_v26, %v198_v31  ;;  %v114_v33 = vcvt.s32.f32 %v112_v32  ;;  %v113_v0 = vcvt.s32.f32 %v111_v58  ;;  %378 = vmatprep.subr.bf16.mxu0 %v472_v41 }
  0xc6   :  { %v200_v34 = vsel %vm199_vm13, %v196_v26, %v198_v31  ;;  %v385_v26 = vpack.c.bf16 %v246_v25, %v245_v24 }
  0xc7   :  { %v202_v36 = vshra.s32 %v200_v34, 16  ;;  %115 = vmin.xlane.f32.xlu1 %v114_v33  ;;  %160 = vmin.xlane.f32.xlu0 %v159_v35  ;;  %v201_v7 = vand.u32 65535, %v200_v34 }
  0xc8   :  { %380 = vmatpush1.bf16.msra.mxu0 %v379_v20 }
  0xc9   :  { %v204_v37 = vcvt.s32.f32 %v202_v36  ;;  %v203_v13 = vcvt.s32.f32 %v201_v7  ;;  %381 = vmatprep.subr.bf16.mxu0 %v472_v41 }
  0xcb   :  { %205 = vmin.xlane.f32.xlu1 %v204_v37 }
  0xcc   :  { %383 = vmatpush1.bf16.msra.mxu0 %v382_v23 }
  0xcd   :  { %384 = vmatprep.subr.bf16.mxu0 %v472_v41 }
  0xd0   :  { %386 = vmatpush1.bf16.msra.mxu0 %v385_v26 }
 0x150   :  { %v73_v59 = vpop.xlane.xlu0 %72 }
 0x151   :  { %vm74_vm14 = vcmp.eq.f32.partialorder %v71_v28, %v73_v59  ;;  %v79_v27 = vcvt.f32.s32 %v73_v59 }
 0x152   :  { %v75_v62 = vsel %vm74_vm14, %v70_v60, inf }
 0x153   :  { %76 = vmin.xlane.f32.xlu0 %v75_v62  ;;  %v80_v30 = vshll.u32 %v79_v27, 16 }
 0x154   :  { %v116_v63 = vpop.xlane.xlu1 %115  ;;  %v161_v8 = vpop.xlane.xlu0 %160 }
 0x155   :  { %vm117_vm15 = vcmp.eq.f32.partialorder %v114_v33, %v116_v63  ;;  %vm162_vm0 = vcmp.eq.f32.partialorder %v159_v35, %v161_v8  ;;  %v122_v28 = vcvt.f32.s32 %v116_v63  ;;  %v167_v31 = vcvt.f32.s32 %v161_v8  ;;  %v355_v63 = vld [vmem:[%s641_s2] ss:$0 sm:$0xff] }
 0x156   :  { %v118_v10 = vsel %vm117_vm15, %v113_v0, inf  ;;  %v163_v11 = vsel %vm162_vm0, %v158_v9, inf  ;;  %vm223_vm0 = vmor %vm178_vm3, %vm180_vm6 }
 0x157   :  { %119 = vmin.xlane.f32.xlu1 %v118_v10  ;;  %164 = vmin.xlane.f32.xlu0 %v163_v11  ;;  %v123_v36 = vshll.u32 %v122_v28, 16  ;;  %v168_v39 = vshll.u32 %v167_v31, 16 }
 0x158   :  { %v206_v12 = vpop.xlane.xlu1 %205 }
 0x159   :  { %vm207_vm1 = vcmp.eq.f32.partialorder %v204_v37, %v206_v12  ;;  %v212_v33 = vcvt.f32.s32 %v206_v12 }
 0x15a   :  { %v208_v14 = vsel %vm207_vm1, %v203_v13, inf }
 0x15b   :  { %209 = vmin.xlane.f32.xlu1 %v208_v14  ;;  %v213_v42 = vshll.u32 %v212_v33, 16 }
 0x1e0   :  { %v77_v29 = vpop.xlane.xlu0 %76 }
 0x1e1   :  { %v78_v32 = vcvt.f32.s32 %v77_v29 }
 0x1e3   :  { %v81_v34 = vadd.s32 %v80_v30, %v78_v32 }
 0x1e4   :  { %v120_v35 = vpop.xlane.xlu1 %119  ;;  %v165_v38 = vpop.xlane.xlu0 %164 }
 0x1e5   :  { %v121_v37 = vcvt.f32.s32 %v120_v35  ;;  %vm82_vm2 = vcmp.eq.s32.totalorder %v526_v1, %v81_v34  ;;  %vm83_vm5 = vcmp.eq.s32.totalorder %v538_v3, %v81_v34  ;;  %v166_v40 = vcvt.f32.s32 %v165_v38 }
 0x1e6   :  { %v345_v44 = vsel %vm82_vm2, 1.0, %v473_v43  ;;  %v346_v48 = vsel %vm83_vm5, 1.0, %v473_v43 }
 0x1e7   :  { %v124_v41 = vadd.s32 %v123_v36, %v121_v37  ;;  %v169_v45 = vadd.s32 %v168_v39, %v166_v40 }
 0x1e8   :  { %v210_v46 = vpop.xlane.xlu1 %209 }
 0x1e9   :  { %vm125_vm11 = vcmp.eq.s32.totalorder %v526_v1, %v124_v41  ;;  %vm126_vm12 = vcmp.eq.s32.totalorder %v538_v3, %v124_v41  ;;  %v211_v49 = vcvt.f32.s32 %v210_v46  ;;  %vm170_vm13 = vcmp.eq.s32.totalorder %v526_v1, %v169_v45 }
 0x1ea   :  { %v348_v50 = vsel %vm125_vm11, 1.0, %v473_v43  ;;  %v349_v51 = vsel %vm126_vm12, 1.0, %v473_v43  ;;  %vm171_vm14 = vcmp.eq.s32.totalorder %v538_v3, %v169_v45  ;;  %v351_v53 = vsel %vm170_vm13, 1.0, %v473_v43 }
 0x1eb   :  { %v131_v52 = vadd.f32 %v348_v50, %v345_v44  ;;  %v132_v5 = vadd.f32 %v349_v51, %v346_v48  ;;  %v352_v54 = vsel %vm171_vm14, 1.0, %v473_v43  ;;  %v214_v55 = vadd.s32 %v213_v42, %v211_v49 }
 0x1ed   :  { %v176_v56 = vadd.f32 %v351_v53, %v131_v52  ;;  %v177_v57 = vadd.f32 %v352_v54, %v132_v5  ;;  %vm215_vm7 = vcmp.eq.s32.totalorder %v526_v1, %v214_v55  ;;  %vm216_vm15 = vcmp.eq.s32.totalorder %v538_v3, %v214_v55 }
 0x1ee   :  { %v353_v58 = vsel %vm215_vm7, 1.0, %v473_v43  ;;  %v354_v59 = vsel %vm216_vm15, 1.0, %v473_v43 }
 0x1ef   :  { %v221_v60 = vadd.f32 %v353_v58, %v176_v56  ;;  %v222_v61 = vadd.f32 %v354_v59, %v177_v57 }
 0x1f1   :  { %v226_v2 = vsel %vm183_vm9, %v222_v61, %v547_v6  ;;  %v225_v62 = vsel %vm223_vm0, %v221_v60, %v541_v4 }
 0x1f2   :  { %356 = vmatprep.mubr.msk.f32.mxu0 %vm54_vm8, %v226_v2 }
 0x1f3   :  { %322 = vmatmul.mubr.f32.vlgmr.msra.gmra.mrb[0].mxu0 %v225_v62 }
 0x2c6   :  { %v323_v0 = vpop.f32.mrb[0].mxu0 }
 0x2c7   :  { %v324_v1 = vadd.f32 %v355_v63, %v323_v0  ;;  %v325_v7 = vpop.f32.mrb[1].mxu0 }
 0x2c9   :  { %327 = vst [vmem:[#allocation7] sm:$0xff] %v324_v1 }
 0x2ca   :  { %450 = shalt.err (!%p447_p6)
}
 0x2cb   :  { %s451_s16 = scalar_lea.hbm %s642_s3, 128 }
 0x2cc   :  { %p452_p7 = scmp.ne.s32.totalorder %s642_s3, %s451_s16  ;;  %p455_p8 = scmp.lt.u32.totalorder %s451_s16, %s642_s3 }
 0x2ce   :  { %p457_p9 = pnand %p455_p8, %p452_p7 }
 0x2d0   :  { %460 = shalt.err (!%p457_p9)
}
 0x2d1   :  { %337 = dma.vmem_to_hbm [thread:$0]  %s335_s12, 128, %s642_s3, [#allocation4]  }
 0x2d2   :  { %465 = dma.done.wait [#allocation4], 128  }
 0x2d3   :  { %466 = vsyncadd [#allocation4], 4294967168 }
 0x2d4   :  { %341 = vsyncpa [#allocation3], 1 }
 0x2d5   :  { %342 = vsyncpa [#allocation6], 1 }
 0x2d6   :  { %343 = vsyncpa [#allocation4], 1 }

</bundles_post_ra>
